<compile_context>
chip_gen: v6e
topology: v6e:2x2x1
jax: 0.10.0
libtpu: 0.0.40
codegen_flags: <defaults>
</compile_context>

<pallas_src>
import functools

import jax
import jax.numpy as jnp
from jax.experimental import pallas as pl
from jax.experimental.pallas import tpu as pltpu


def _label_smoothing_kernel(x_ref, t_ref, o_ref,
                            m_ref, d_ref, rs_ref, xt_ref,
                            *, confidence, smooth_val, n_valid, num_classes,
                            tile_n, tile_c, col_masked):
    i = pl.program_id(0)                 # row-tile index ("parallel")
    j = pl.program_id(1)                 # class-tile index (innermost reduction)
    n_col = pl.num_programs(1)

    @pl.when(j == 0)
    def _():
        m_ref[...] = jnp.full_like(m_ref, -jnp.inf)   # running row max
        d_ref[...] = jnp.zeros_like(d_ref)            # running sum(exp(x - m))
        rs_ref[...] = jnp.zeros_like(rs_ref)          # running sum(x)
        xt_ref[...] = jnp.zeros_like(xt_ref)          # running x[i, target[i]]

    xf = x_ref[...].astype(jnp.float32)                           # (TILE_N, TILE_C)
    col = j * tile_c + jax.lax.broadcasted_iota(jnp.int32, xf.shape, 1)
    tgt = t_ref[...]                                              # (TILE_N, 1) int32

    if col_masked:
        # Ragged last class block: keep OOB columns out of every reduction.
        valid = col < num_classes
        x_for_max = jnp.where(valid, xf, -jnp.inf)
        x_for_sum = jnp.where(valid, xf, 0.0)
    else:
        x_for_max = xf
        x_for_sum = xf

    # Online (streaming) max / exp-sum, shifted exp for numerical stability.
    m_old = m_ref[...]
    m_new = jnp.maximum(m_old, jnp.max(x_for_max, axis=-1, keepdims=True))
    alpha = jnp.exp(m_old - m_new)
    p = jnp.exp(x_for_max - m_new)        # masked cols: exp(-inf - m) == 0
    d_ref[...] = alpha * d_ref[...] + jnp.sum(p, axis=-1, keepdims=True)
    m_ref[...] = m_new

    # Raw row-sum accumulation: its loss term is scaled by sv = smoothing/(C-1),
    # so f32 cancellation against C*lse is negligible even at very large C.
    rs_ref[...] += jnp.sum(x_for_sum, axis=-1, keepdims=True)
    # x[i, target[i]] via iota compare (replaces PyTorch scatter_/gather);
    # each row's target lands in exactly one class block.
    xt_ref[...] += jnp.sum(jnp.where(col == tgt, xf, 0.0), axis=-1, keepdims=True)

    @pl.when(j == n_col - 1)
    def _():
        lse = m_ref[...] + jnp.log(d_ref[...])
        loss = (-(confidence - smooth_val) * (xt_ref[...] - lse)
                - smooth_val * (rs_ref[...] - float(num_classes) * lse))
        # Mask rows that belong to the ragged batch tail (no HBM padding copy).
        row_id = i * tile_n + jax.lax.broadcasted_iota(jnp.int32, (tile_n, 1), 0)
        loss = jnp.where(row_id < n_valid, loss, 0.0)
        # Lane-dense, (8,128)-aligned per-tile partial sum; wrapper reads [:,0,0].
        o_ref[...] = jnp.sum(loss) + jnp.zeros((1, 8, 128), jnp.float32)


# Per-tile working-set budget (bytes).  Conservative for v7x's 64 MiB physical
# VMEM; well under v5e/v6e's 128 MiB.  vmem_limit below leaves extra headroom.
_VMEM_TILE_BUDGET = 32 * 1024 * 1024
_VMEM_LIMIT_BYTES = 48 * 1024 * 1024
_MAX_TILE_N = 2048


def _choose_tiles(n, c, itemsize):
    """Pick (tile_n, tile_c) from a VMEM byte budget, not a fixed row cap."""
    # Per (row, class) element: double-buffered x block + ~5 f32 temporaries
    # (f32 upcast, exp result, iota, compare/select results).
    elem_bytes = 2 * itemsize + 20
    # Per row: double-buffered target block + 4 f32 scratch columns (all padded
    # to 128 lanes in VMEM).
    row_bytes = 2 * 128 * 4 + 4 * 128 * 4
    n_up8 = ((n + 7) // 8) * 8

    rows = _VMEM_TILE_BUDGET // (c * elem_bytes + row_bytes)
    rows = (rows // 8) * 8
    if rows >= 8:
        # Full class axis fits: single inner step, no column masking.
        return min(rows, _MAX_TILE_N, n_up8), c

    # Very large vocabulary: minimum row tile, stream the class axis.
    tile_n = 8
    cols = (_VMEM_TILE_BUDGET - tile_n * row_bytes) // (tile_n * elem_bytes)
    cols = max(128, (cols // 128) * 128)
    return tile_n, min(cols, c)


def label_smoothing_loss(x, target, classes, smoothing=0.1, *,
                         tile_n=None, tile_c=None):
    """x: (N, C) float32/bf16 logits, target: (N,) int labels -> scalar f32 loss."""
    n, c = x.shape
    assert c == classes, "class axis of x must equal `classes`"
    assert classes > 1, "smoothing/(classes-1) undefined for classes == 1"
    confidence = 1.0 - smoothing
    smooth_val = smoothing / (classes - 1)

    auto_n, auto_c = _choose_tiles(n, c, jnp.dtype(x.dtype).itemsize)
    tile_n = auto_n if tile_n is None else tile_n
    tile_c = auto_c if tile_c is None else tile_c

    num_row = pl.cdiv(n, tile_n)          # ragged last row block -> in-kernel mask
    num_col = pl.cdiv(c, tile_c)          # ragged last class block -> column mask

    target2d = target.astype(jnp.int32).reshape(n, 1)

    kernel = functools.partial(
        _label_smoothing_kernel,
        confidence=confidence, smooth_val=smooth_val,
        n_valid=n, num_classes=c,
        tile_n=tile_n, tile_c=tile_c,
        col_masked=(c % tile_c != 0))

    partials = pl.pallas_call(
        kernel,
        out_shape=jax.ShapeDtypeStruct((num_row, 8, 128), jnp.float32),
        grid=(num_row, num_col),
        in_specs=[
            pl.BlockSpec((tile_n, tile_c), lambda i, j: (i, j)),
            pl.BlockSpec((tile_n, 1), lambda i, j: (i, 0)),
        ],
        out_specs=pl.BlockSpec((1, 8, 128), lambda i, j: (i, 0, 0)),
        scratch_shapes=[pltpu.VMEM((tile_n, 1), jnp.float32)] * 4,
        compiler_params=pltpu.CompilerParams(
            dimension_semantics=("parallel", "arbitrary"),
            vmem_limit_bytes=_VMEM_LIMIT_BYTES),
    )(x, target2d)

    return jnp.sum(partials[:, 0, 0]) / n


def _reference(x, target, classes, smoothing=0.1):
    confidence = 1.0 - smoothing
    logprobs = jax.nn.log_softmax(x.astype(jnp.float32), axis=-1)
    true_dist = jnp.full_like(logprobs, smoothing / (classes - 1))
    true_dist = true_dist.at[jnp.arange(x.shape[0]), target].set(confidence)
    return jnp.mean(jnp.sum(-true_dist * logprobs, axis=-1))


if __name__ == "__main__":
    key = jax.random.PRNGKey(0)
    kx, kt = jax.random.split(key)

    # Small shapes consistent with the module (batch=8, classes=32).
    N, C = 8, 32
    x = jax.random.normal(kx, (N, C), dtype=jnp.float32)
    target = jax.random.randint(kt, (N,), 0, C, dtype=jnp.int32)
    loss = jax.block_until_ready(label_smoothing_loss(x, target, classes=C, smoothing=0.1))
    ref = jax.block_until_ready(_reference(x, target, classes=C, smoothing=0.1))
    assert jnp.allclose(loss, ref, atol=1e-5, rtol=1e-5), (loss, ref)

    # Ragged batch + ragged class count: exercises the no-pad row mask path.
    N2, C2 = 37, 200
    x2 = jax.random.normal(kx, (N2, C2), dtype=jnp.float32)
    t2 = jax.random.randint(kt, (N2,), 0, C2, dtype=jnp.int32)
    loss2 = jax.block_until_ready(label_smoothing_loss(x2, t2, classes=C2, smoothing=0.1))
    ref2 = jax.block_until_ready(_reference(x2, t2, classes=C2, smoothing=0.1))
    assert jnp.allclose(loss2, ref2, atol=1e-5, rtol=1e-5), (loss2, ref2)

    # Force the class-tiled streaming path (online max / exp-sum across class
    # blocks, column masking on the ragged last block) at small shapes.
    loss3 = jax.block_until_ready(
        label_smoothing_loss(x2, t2, classes=C2, smoothing=0.1, tile_n=8, tile_c=128))
    assert jnp.allclose(loss3, ref2, atol=1e-5, rtol=1e-5), (loss3, ref2)

    print("KERNEL_OK")
</pallas_src>

<mosaic_0001>
module attributes {stable_mosaic.version = 11 : i64} {
  func.func @_label_smoothing_kernel(%arg0: i32, %arg1: i32, %arg2: memref<8x32xf32, #tpu.memory_space<vmem>>, %arg3: memref<8x1xi32, #tpu.memory_space<vmem>>, %arg4: memref<1x8x128xf32, #tpu.memory_space<vmem>>, %arg5: memref<8x1xf32, #tpu.memory_space<vmem>>, %arg6: memref<8x1xf32, #tpu.memory_space<vmem>>, %arg7: memref<8x1xf32, #tpu.memory_space<vmem>>, %arg8: memref<8x1xf32, #tpu.memory_space<vmem>>) attributes {dimension_semantics = [#tpu.dimension_semantics<parallel>, #tpu.dimension_semantics<arbitrary>], iteration_bounds = array<i64: 1, 1>, scalar_prefetch = 0 : i64, scratch_operands = 4 : i64, tpu.core_type = #tpu.core_type<tc>, window_params = [{transform_indices = @transform_0, window_bounds = array<i64: 8, 32>}, {transform_indices = @transform_1, window_bounds = array<i64: 8, 1>}, {transform_indices = @transform_2, window_bounds = array<i64: 1, 8, 128>}]} {
    %c0_i32 = arith.constant 0 : i32
    %0 = arith.cmpi eq, %arg1, %c0_i32 : i32
    %1 = arith.extui %0 : i1 to i32
    %c0_i32_0 = arith.constant 0 : i32
    %2 = arith.cmpi ne, %1, %c0_i32_0 : i32
    scf.if %2 {
      %cst_26 = arith.constant 0xFF800000 : f32
      %42 = vector.broadcast %cst_26 : f32 to vector<8x1xf32>
      %c0_27 = arith.constant 0 : index
      %c0_28 = arith.constant 0 : index
      %43 = vector.load %arg5[%c0_27, %c0_28] : memref<8x1xf32, #tpu.memory_space<vmem>>, vector<8x1xf32>
      tpu.vector_store %arg5[%c0_27, %c0_28], %42 {strides = array<i32>} : memref<8x1xf32, #tpu.memory_space<vmem>>, vector<8x1xf32>,
      %cst_29 = arith.constant 0.000000e+00 : f32
      %44 = vector.broadcast %cst_29 : f32 to vector<8x1xf32>
      %c0_30 = arith.constant 0 : index
      %c0_31 = arith.constant 0 : index
      %45 = vector.load %arg6[%c0_30, %c0_31] : memref<8x1xf32, #tpu.memory_space<vmem>>, vector<8x1xf32>
      tpu.vector_store %arg6[%c0_30, %c0_31], %44 {strides = array<i32>} : memref<8x1xf32, #tpu.memory_space<vmem>>, vector<8x1xf32>,
      %cst_32 = arith.constant 0.000000e+00 : f32
      %46 = vector.broadcast %cst_32 : f32 to vector<8x1xf32>
      %c0_33 = arith.constant 0 : index
      %c0_34 = arith.constant 0 : index
      %47 = vector.load %arg7[%c0_33, %c0_34] : memref<8x1xf32, #tpu.memory_space<vmem>>, vector<8x1xf32>
      tpu.vector_store %arg7[%c0_33, %c0_34], %46 {strides = array<i32>} : memref<8x1xf32, #tpu.memory_space<vmem>>, vector<8x1xf32>,
      %cst_35 = arith.constant 0.000000e+00 : f32
      %48 = vector.broadcast %cst_35 : f32 to vector<8x1xf32>
      %c0_36 = arith.constant 0 : index
      %c0_37 = arith.constant 0 : index
      %49 = vector.load %arg8[%c0_36, %c0_37] : memref<8x1xf32, #tpu.memory_space<vmem>>, vector<8x1xf32>
      tpu.vector_store %arg8[%c0_36, %c0_37], %48 {strides = array<i32>} : memref<8x1xf32, #tpu.memory_space<vmem>>, vector<8x1xf32>,
    } else {
    }
    %c0 = arith.constant 0 : index
    %c0_1 = arith.constant 0 : index
    %3 = vector.load %arg2[%c0, %c0_1] : memref<8x32xf32, #tpu.memory_space<vmem>>, vector<8x32xf32>
    %c32_i32 = arith.constant 32 : i32
    %4 = arith.muli %arg1, %c32_i32 : i32
    %5 = tpu.iota {dimensions = array<i32: 1>} : vector<8x32xi32>
    %6 = vector.broadcast %4 : i32 to vector<8x32xi32>
    %7 = arith.addi %6, %5 : vector<8x32xi32>
    %c0_2 = arith.constant 0 : index
    %c0_3 = arith.constant 0 : index
    %8 = vector.load %arg3[%c0_2, %c0_3] : memref<8x1xi32, #tpu.memory_space<vmem>>, vector<8x1xi32>
    %c0_4 = arith.constant 0 : index
    %c0_5 = arith.constant 0 : index
    %9 = vector.load %arg5[%c0_4, %c0_5] : memref<8x1xf32, #tpu.memory_space<vmem>>, vector<8x1xf32>
    %cst = arith.constant dense<0xFF800000> : vector<8xf32>
    %10 = vector.multi_reduction <maximumf>, %3, %cst [1] : vector<8x32xf32> to vector<8xf32>
    %11 = vector.shape_cast %10 : vector<8xf32> to vector<8x1xf32>
    %12 = arith.maximumf %9, %11 : vector<8x1xf32>
    %13 = arith.subf %9, %12 : vector<8x1xf32>
    %14 = math.exp %13 : vector<8x1xf32>
    %15 = vector.broadcast %12 : vector<8x1xf32> to vector<8x32xf32>
    %16 = arith.subf %3, %15 : vector<8x32xf32>
    %17 = math.exp %16 : vector<8x32xf32>
    %c0_6 = arith.constant 0 : index
    %c0_7 = arith.constant 0 : index
    %18 = vector.load %arg6[%c0_6, %c0_7] : memref<8x1xf32, #tpu.memory_space<vmem>>, vector<8x1xf32>
    %19 = arith.mulf %14, %18 : vector<8x1xf32>
    %cst_8 = arith.constant dense<0.000000e+00> : vector<8xf32>
    %20 = vector.multi_reduction <add>, %17, %cst_8 [1] : vector<8x32xf32> to vector<8xf32>
    %21 = vector.shape_cast %20 : vector<8xf32> to vector<8x1xf32>
    %22 = arith.addf %19, %21 : vector<8x1xf32>
    %c0_9 = arith.constant 0 : index
    %c0_10 = arith.constant 0 : index
    %23 = vector.load %arg6[%c0_9, %c0_10] : memref<8x1xf32, #tpu.memory_space<vmem>>, vector<8x1xf32>
    tpu.vector_store %arg6[%c0_9, %c0_10], %22 {strides = array<i32>} : memref<8x1xf32, #tpu.memory_space<vmem>>, vector<8x1xf32>,
    %c0_11 = arith.constant 0 : index
    %c0_12 = arith.constant 0 : index
    %24 = vector.load %arg5[%c0_11, %c0_12] : memref<8x1xf32, #tpu.memory_space<vmem>>, vector<8x1xf32>
    tpu.vector_store %arg5[%c0_11, %c0_12], %12 {strides = array<i32>} : memref<8x1xf32, #tpu.memory_space<vmem>>, vector<8x1xf32>,
    %c0_13 = arith.constant 0 : index
    %c0_14 = arith.constant 0 : index
    %25 = vector.load %arg7[%c0_13, %c0_14] : memref<8x1xf32, #tpu.memory_space<vmem>>, vector<8x1xf32>
    %cst_15 = arith.constant dense<0.000000e+00> : vector<8xf32>
    %26 = vector.multi_reduction <add>, %3, %cst_15 [1] : vector<8x32xf32> to vector<8xf32>
    %27 = vector.shape_cast %26 : vector<8xf32> to vector<8x1xf32>
    %28 = arith.addf %25, %27 : vector<8x1xf32>
    %c0_16 = arith.constant 0 : index
    %c0_17 = arith.constant 0 : index
    %29 = vector.load %arg7[%c0_16, %c0_17] : memref<8x1xf32, #tpu.memory_space<vmem>>, vector<8x1xf32>
    tpu.vector_store %arg7[%c0_16, %c0_17], %28 {strides = array<i32>} : memref<8x1xf32, #tpu.memory_space<vmem>>, vector<8x1xf32>,
    %c0_18 = arith.constant 0 : index
    %c0_19 = arith.constant 0 : index
    %30 = vector.load %arg8[%c0_18, %c0_19] : memref<8x1xf32, #tpu.memory_space<vmem>>, vector<8x1xf32>
    %31 = vector.broadcast %8 : vector<8x1xi32> to vector<8x32xi32>
    %32 = arith.cmpi eq, %7, %31 : vector<8x32xi32>
    %cst_20 = arith.constant 0.000000e+00 : f32
    %33 = vector.broadcast %cst_20 : f32 to vector<8x32xf32>
    %34 = arith.select %32, %3, %33 : vector<8x32xi1>, vector<8x32xf32>
    %cst_21 = arith.constant dense<0.000000e+00> : vector<8xf32>
    %35 = vector.multi_reduction <add>, %34, %cst_21 [1] : vector<8x32xf32> to vector<8xf32>
    %36 = vector.shape_cast %35 : vector<8xf32> to vector<8x1xf32>
    %37 = arith.addf %30, %36 : vector<8x1xf32>
    %c0_22 = arith.constant 0 : index
    %c0_23 = arith.constant 0 : index
    %38 = vector.load %arg8[%c0_22, %c0_23] : memref<8x1xf32, #tpu.memory_space<vmem>>, vector<8x1xf32>
    tpu.vector_store %arg8[%c0_22, %c0_23], %37 {strides = array<i32>} : memref<8x1xf32, #tpu.memory_space<vmem>>, vector<8x1xf32>,
    %c0_i32_24 = arith.constant 0 : i32
    %39 = arith.cmpi eq, %arg1, %c0_i32_24 : i32
    %40 = arith.extui %39 : i1 to i32
    %c0_i32_25 = arith.constant 0 : i32
    %41 = arith.cmpi ne, %40, %c0_i32_25 : i32
    scf.if %41 {
      %c0_26 = arith.constant 0 : index
      %c0_27 = arith.constant 0 : index
      %42 = vector.load %arg5[%c0_26, %c0_27] : memref<8x1xf32, #tpu.memory_space<vmem>>, vector<8x1xf32>
      %c0_28 = arith.constant 0 : index
      %c0_29 = arith.constant 0 : index
      %43 = vector.load %arg6[%c0_28, %c0_29] : memref<8x1xf32, #tpu.memory_space<vmem>>, vector<8x1xf32>
      %44 = math.log %43 : vector<8x1xf32>
      %45 = arith.addf %42, %44 : vector<8x1xf32>
      %c0_30 = arith.constant 0 : index
      %c0_31 = arith.constant 0 : index
      %46 = vector.load %arg8[%c0_30, %c0_31] : memref<8x1xf32, #tpu.memory_space<vmem>>, vector<8x1xf32>
      %47 = arith.subf %46, %45 : vector<8x1xf32>
      %cst_32 = arith.constant -0.896774172 : f32
      %48 = vector.broadcast %cst_32 : f32 to vector<8x1xf32>
      %49 = arith.mulf %48, %47 : vector<8x1xf32>
      %c0_33 = arith.constant 0 : index
      %c0_34 = arith.constant 0 : index
      %50 = vector.load %arg7[%c0_33, %c0_34] : memref<8x1xf32, #tpu.memory_space<vmem>>, vector<8x1xf32>
      %cst_35 = arith.constant 3.200000e+01 : f32
      %51 = vector.broadcast %cst_35 : f32 to vector<8x1xf32>
      %52 = arith.mulf %51, %45 : vector<8x1xf32>
      %53 = arith.subf %50, %52 : vector<8x1xf32>
      %cst_36 = arith.constant 0.0032258064 : f32
      %54 = vector.broadcast %cst_36 : f32 to vector<8x1xf32>
      %55 = arith.mulf %54, %53 : vector<8x1xf32>
      %56 = arith.subf %49, %55 : vector<8x1xf32>
      %c8_i32 = arith.constant 8 : i32
      %57 = arith.muli %arg0, %c8_i32 : i32
      %58 = tpu.iota {dimensions = array<i32: 0>} : vector<8x1xi32>
      %59 = vector.broadcast %57 : i32 to vector<8x1xi32>
      %60 = arith.addi %59, %58 : vector<8x1xi32>
      %c8_i32_37 = arith.constant 8 : i32
      %61 = vector.broadcast %c8_i32_37 : i32 to vector<8x1xi32>
      %62 = arith.cmpi slt, %60, %61 : vector<8x1xi32>
      %cst_38 = arith.constant 0.000000e+00 : f32
      %63 = vector.broadcast %cst_38 : f32 to vector<8x1xf32>
      %64 = arith.select %62, %56, %63 : vector<8x1xi1>, vector<8x1xf32>
      %65 = vector.shape_cast %64 : vector<8x1xf32> to vector<1x8x1xf32>
      %cst_39 = arith.constant dense<0.000000e+00> : vector<1xf32>
      %66 = vector.multi_reduction <add>, %65, %cst_39 [1, 2] : vector<1x8x1xf32> to vector<1xf32>
      %67 = vector.shape_cast %66 : vector<1xf32> to vector<1x1x1xf32>
      %68 = vector.extract %67[0, 0, 0] : f32 from vector<1x1x1xf32>
      %cst_40 = arith.constant 0.000000e+00 : f32
      %69 = vector.broadcast %cst_40 : f32 to vector<1x8x128xf32>
      %70 = vector.broadcast %68 : f32 to vector<1x8x128xf32>
      %71 = arith.addf %70, %69 : vector<1x8x128xf32>
      %c0_41 = arith.constant 0 : index
      %c0_42 = arith.constant 0 : index
      %c0_43 = arith.constant 0 : index
      %72 = vector.load %arg4[%c0_41, %c0_42, %c0_43] : memref<1x8x128xf32, #tpu.memory_space<vmem>>, vector<1x8x128xf32>
      tpu.vector_store %arg4[%c0_41, %c0_42, %c0_43], %71 {strides = array<i32>} : memref<1x8x128xf32, #tpu.memory_space<vmem>>, vector<1x8x128xf32>,
    } else {
    }
    return
  }
  func.func @transform_0(%arg0: i32, %arg1: i32) -> (i32, i32) {
    %c0_i32 = arith.constant 0 : i32
    return %arg0, %arg1 : i32, i32
  }
  func.func @transform_1(%arg0: i32, %arg1: i32) -> (i32, i32) {
    %c0_i32 = arith.constant 0 : i32
    %c0_i32_0 = arith.constant 0 : i32
    return %arg0, %c0_i32 : i32, i32
  }
  func.func @transform_2(%arg0: i32, %arg1: i32) -> (i32, i32, i32) {
    %c0_i32 = arith.constant 0 : i32
    %c0_i32_0 = arith.constant 0 : i32
    %c0_i32_1 = arith.constant 0 : i32
    return %arg0, %c0_i32, %c0_i32_0 : i32, i32, i32
  }
}

</mosaic_0001>

<bundles_post_ra>
// kernel: tpu_custom_call.1
= control target key start
LH: loop header
LB: loop body
LE: loop exit
PB: predicated region body
PF: predicated region fallthrough
CT: control target
= control target key end

     0   :  { %vm29_vm0 = vcmask 261120   ;;  %s198_s0 = inlined_call_operand.vmem [shape: f32[8,32], index: 0, kind: input, shape index: {}]   ;;  %s199_s1 = inlined_call_operand.vmem [shape: s32[8,1], index: 1, kind: input, shape index: {}]   ;;  %s200_s2 = inlined_call_operand.hbm [shape: f32[1,8,128], index: 2, kind: output, shape index: {}]  }
   0x1   :  { %v21_v0 = vld [vmem:[%s198_s0] sm:$0xff] }
   0x2   :  { %7 = vsyncpa [#allocation7], 0  ;;  %v30_v1 = vsel %vm29_vm0, %v21_v0, -inf  ;;  %vm16_vm1 = vcmask 7168   ;;  %v157_v2 = vmov -inf   ;;  %v158_v3 = vmov 0  }
   0x3   :  { %31 = vmax.xlane.f32.xlu0 %v30_v1  ;;  %17 = vst.msk [vmem:[#allocation2] sm:$0xff] %vm16_vm1, %v157_v2  ;;  %128 = vset.pattern.permute.xlu1 %v158_v3  ;;  %v27_v4 = vld [vmem:[%s199_s1] sm:$0xff]  ;;  %v159_v5 = vmov 0.0   ;;  %v23_v13 = vlaneseq  ;;  %v55_v18 = vsel %vm29_vm0, %v21_v0, 0.0  ;;  %s160_s0 = smov [#allocation6]  }
   0x4   :  { %127 = vset.pattern.permute.xlu0 %v158_v3  ;;  %62 = vperm.xlu1 %128, %v27_v4   ;;  %18 = vst.msk [vmem:[#allocation3] sm:$0xff] %vm16_vm1, %v159_v5  ;;  %19 = vst.msk [vmem:[#allocation4] sm:$0xff] %vm16_vm1, %v159_v5  ;;  %s113_s1 = sshll.u32 %s160_s0, 4  ;;  %s114_s1 = int_to_ptr.vmem [resolvable:$true] %s113_s1 }
   0x5   :  { %20 = vst.msk [vmem:[#allocation5] sm:$0xff] %vm16_vm1, %v159_v5  ;;  %v24_v14 = vand.u32 127, %v23_v13  ;;  %s135_s14 = scalar_lea.vmem %s114_s1, 128  ;;  %p140_p1 = scmp.lt.s32.totalorder %s114_s1, %s114_s1 }
   0x6   :  { %p136_p0 = scmp.ne.s32.totalorder %s114_s1, %s135_s14  ;;  %p141_p2 = scmp.lt.s32.totalorder %s135_s14, %s135_s14 }
   0x8   :  { %p142_p3 = por %p141_p2, %p140_p1 }
   0xa   :  { %v28_v6 = vld [vmem:[#allocation2] sm:$0xff]  ;;  %p143_p4 = pnand %p142_p3, %p136_p0 }
   0xb   :  { %v45_v23 = vld [vmem:[#allocation3] sm:$0xff]  ;;  %v54_v27 = vld [vmem:[#allocation4] sm:$0xff] }
   0xc   :  { %v60_v30 = vld [vmem:[#allocation5] sm:$0xff] }
  0x7f   :  { %v63_v15 = vpop.permute.xlu1 %62 }
  0x80   :  { %vm64_vm2 = vcmp.eq.s32.totalorder %v24_v14, %v63_v15 }
  0x81   :  { %v65_v19 = vsel %vm64_vm2, %v21_v0, 0.0 }
  0x82   :  { %v66_v20 = vsel %vm29_vm0, %v65_v19, 0.0 }
  0x8c   :  { %v32_v7 = vpop.xlane.xlu0 %31 }
  0x8d   :  { %v33_v8 = vmax.f32 %v28_v6, %v32_v7 }
  0x8f   :  { %v34_v9 = vsub.f32 %v28_v6, %v33_v8  ;;  %53 = vst.msk [vmem:[#allocation2] sm:$0xff] %vm16_vm1, %v33_v8  ;;  %39 = vperm.xlu0 %127, %v33_v8  }
  0x91   :  { %v35_v21 = vmul.f32 1.442695, %v34_v9 }
  0x96   :  { %v74_v36 = vld [vmem:[#allocation2] sm:$0xff] }
 0x10a   :  { %v40_v10 = vpop.permute.xlu0 %39 }
 0x10b   :  { %v42_v11 = vsub.f32 %v21_v0, %v40_v10 }
 0x10d   :  { %v43_v12 = vmul.f32 1.442695, %v42_v11 }
 0x10f   :  { %129 = vpow2.f32 %v43_v12 }
 0x110   :  { %131 = vpow2.f32 %v35_v21 }
 0x11c   :  { %v130_v16 = vpop.eup %129 }
 0x11d   :  { %v47_v17 = vsel %vm29_vm0, %v130_v16, 0.0  ;;  %v132_v22 = vpop.eup %131 }
 0x11e   :  { %48 = vadd.xlane.f32.xlu1 %v47_v17  ;;  %v46_v24 = vmul.f32 %v132_v22, %v45_v23 }
 0x122   :  { %56 = vadd.xlane.f32.xlu1 %v55_v18 }
 0x126   :  { %67 = vadd.xlane.f32.xlu1 %v66_v20 }
 0x1a7   :  { %v49_v25 = vpop.xlane.xlu1 %48 }
 0x1a8   :  { %v50_v26 = vadd.f32 %v49_v25, %v46_v24 }
 0x1aa   :  { %52 = vst.msk [vmem:[#allocation3] sm:$0xff] %vm16_vm1, %v50_v26 }
 0x1ab   :  { %v57_v28 = vpop.xlane.xlu1 %56 }
 0x1ac   :  { %v58_v29 = vadd.f32 %v57_v28, %v54_v27 }
 0x1ae   :  { %59 = vst.msk [vmem:[#allocation4] sm:$0xff] %vm16_vm1, %v58_v29 }
 0x1af   :  { %v68_v31 = vpop.xlane.xlu1 %67 }
 0x1b0   :  { %v69_v32 = vadd.f32 %v68_v31, %v60_v30 }
 0x1b1   :  { %v75_v33 = vld [vmem:[#allocation3] sm:$0xff] }
 0x1b2   :  { %70 = vst.msk [vmem:[#allocation5] sm:$0xff] %vm16_vm1, %v69_v32  ;;  %133 = vlog2.f32 %v75_v33 }
 0x1b5   :  { %v82_v41 = vld [vmem:[#allocation4] sm:$0xff] }
 0x1b9   :  { %v79_v37 = vld [vmem:[#allocation5] sm:$0xff] }
 0x1bf   :  { %v134_v34 = vpop.eup %133 }
 0x1c0   :  { %v77_v35 = vmul.f32 0.6931472, %v134_v34 }
 0x1c2   :  { %v78_v38 = vadd.f32 %v77_v35, %v74_v36 }
 0x1c4   :  { %v80_v39 = vsub.f32 %v79_v37, %v78_v38  ;;  %v83_v40 = vmul.f32 32.0, %v78_v38 }
 0x1c6   :  { %v84_v42 = vsub.f32 %v82_v41, %v83_v40  ;;  %v81_v43 = vmul.f32 -0.8967742, %v80_v39 }
 0x1c8   :  { %v85_v44 = vmul.f32 0.0032258064, %v84_v42 }
 0x1ca   :  { %v86_v45 = vsub.f32 %v81_v43, %v85_v44 }
 0x1cc   :  { %v94_v46 = vsel %vm16_vm1, %v86_v45, 0.0 }
 0x1cd   :  { %95 = vadd.xlane.f32.xlu0 %v94_v46 }
 0x256   :  { %v96_v47 = vpop.xlane.xlu0 %95 }
 0x257   :  { %v97_v48 = vrot.slane %v96_v47, 4 }
 0x259   :  { %v98_v49 = vadd.f32 %v97_v48, %v96_v47 }
 0x25b   :  { %v99_v50 = vrot.slane %v98_v49, 2 }
 0x25d   :  { %v100_v51 = vadd.f32 %v99_v50, %v98_v49 }
 0x25f   :  { %v101_v52 = vrot.slane %v100_v51, 1 }
 0x261   :  { %v102_v53 = vadd.f32 %v101_v52, %v100_v51 }
 0x263   :  { %121 = vpush %v102_v53 }
 0x294   :  { %s122_s13 = spop %121 }
 0x295   :  { %v104_v54 = vstv %s122_s13 }
 0x296   :  { %106 = vst [vmem:[#allocation6] sm:$0xff] %v104_v54 }
 0x297   :  { %146 = shalt.err (!%p143_p4)
}
 0x298   :  { %116 = dma.vmem_to_hbm [thread:$0]  %s114_s1, 128, %s200_s2, [#allocation7]  }
 0x299   :  { %155 = dma.done.wait [#allocation7], 128  }
 0x29a   :  { %156 = vsyncadd [#allocation7], 4294967168 }
 0x29b   :  { %120 = vsyncpa [#allocation7], 1 }

</bundles_post_ra>
